<compile_context>
chip_gen: v5e
topology: v5e:2x2
jax: 0.10.0
libtpu: 0.0.40
codegen_flags: <defaults>
</compile_context>

<pallas_src>
import jax
import jax.numpy as jnp
from jax.experimental import pallas as pl
from jax.experimental.pallas import tpu as pltpu


def _round_up(x, m):
    return ((x + m - 1) // m) * m


def _pick_tiles(B, N, M, dmat_budget_bytes, total_budget_bytes, max_bt=64):
    """Choose (Bt, Mt, M_pad).

    Mt is either the full M (small clouds) or a multiple of 128 such that the
    per-cloud (N, Mt) f32 distance chunk fits `dmat_budget_bytes`.  Bt is the
    largest divisor of B that keeps the whole working set (dmat chunk +
    double-buffered padded input tiles + row-min scratch) under
    `total_budget_bytes`, preferring >= 2 batch grid steps (v7x megacore).
    """
    npad = _round_up(N, 8)            # dmat sublane padding
    nlane = _round_up(N, 128)         # pred tile lane padding
    mlane_full = _round_up(M, 128)

    if npad * mlane_full * 4 <= dmat_budget_bytes:
        mt, m_pad = M, M
    else:
        mt = max(128, (dmat_budget_bytes // (npad * 4)) // 128 * 128)
        m_pad = _round_up(M, mt)
    mlane = _round_up(mt, 128)

    def footprint(bt):
        dmat = npad * mlane * 4                   # distance chunk (f32)
        pred_tile = 8 * nlane * 4 * 2             # (Bt,5->8,N) dbl-buffered
        targ_tile = 8 * mlane * 4 * 2             # (Bt,5->8,Mt) dbl-buffered
        rowmin = npad * 128 * 4                   # (Bt,N,1) scratch, lane-padded
        return bt * (dmat + pred_tile + targ_tile + rowmin)

    divs = [d for d in range(1, min(B, max_bt) + 1) if B % d == 0]
    fit = [d for d in divs if footprint(d) <= total_budget_bytes] or [1]
    multi = [d for d in fit if B // d >= 2]
    bt = max(multi) if multi else max(fit)
    return bt, mt, m_pad


def _make_chamfer_kernel(n_pts, m_pts, mt, needs_mask):
    """Kernel closure: streaming symmetric chamfer over M chunks.

    pred_ref : (Bt, 5, N)  f32  augmented pred   [x, 1, ||x||^2] (lane-dense)
    targ_ref : (Bt, 5, Mt) f32  augmented target [-2y, ||y||^2, 1] chunk
    out_ref  : (Bt, 1, 1)  per-cloud chamfer term
    row_min  : (Bt, N, 1)  running pred->target min
    col_sum  : (Bt, 1, 1)  running sum of target->pred column mins
    """
    inv_n = 1.0 / float(n_pts)
    inv_m = 1.0 / float(m_pts)

    def kernel(pred_ref, targ_ref, out_ref, row_min_ref, col_sum_ref):
        mg = pl.program_id(1)

        @pl.when(mg == 0)
        def _init():
            row_min_ref[...] = jnp.full_like(row_min_ref, jnp.inf)
            col_sum_ref[...] = jnp.zeros_like(col_sum_ref)

        a = pred_ref[...]            # (Bt, 5, N)
        b = targ_ref[...]            # (Bt, 5, Mt)

        # dmat[b,n,m] = ||x_n||^2 + ||y_m||^2 - 2 x_n.y_m, one MXU pass (K=5->8)
        dmat = jnp.einsum("bkn,bkm->bnm", a, b,
                          preferred_element_type=jnp.float32)   # (Bt, N, Mt)

        # pred -> target: running row minimum over M chunks.
        row_min_ref[...] = jnp.minimum(
            row_min_ref[...], jnp.min(dmat, axis=2, keepdims=True))

        # target -> pred: column mins of this chunk (complete: N not tiled),
        # clamp the reduced mins only, mask padded sentinel columns, accumulate.
        col_min = jnp.min(dmat, axis=1, keepdims=True)           # (Bt, 1, Mt)
        col_min = jnp.maximum(col_min, 0.0)
        if needs_mask:
            col = jax.lax.broadcasted_iota(jnp.int32, col_min.shape, 2)
            col_min = jnp.where(mg * mt + col < m_pts, col_min, 0.0)
        col_sum_ref[...] += jnp.sum(col_min, axis=2, keepdims=True)

        @pl.when(mg == pl.num_programs(1) - 1)
        def _finalize():
            cham_x = jnp.sum(jnp.maximum(row_min_ref[...], 0.0),
                             axis=1, keepdims=True) * inv_n      # (Bt, 1, 1)
            cham_y = col_sum_ref[...] * inv_m                    # (Bt, 1, 1)
            out_ref[...] = cham_x + cham_y

    return kernel


def get_loss(pred, target, bpp, lamda, *,
             dmat_budget_bytes=6 << 20, total_budget_bytes=18 << 20):
    """pred: (B, N, 3), target: (B, M, 3); bpp / lamda: python or 0-d scalars."""
    B, N, _ = pred.shape
    _, M, _ = target.shape

    Bt, Mt, M_pad = _pick_tiles(B, N, M, dmat_budget_bytes, total_budget_bytes)

    # Augmented, lane-dense operands (points on lanes, K=5 on sublanes), f32.
    p = jnp.swapaxes(pred.astype(jnp.float32), 1, 2)      # (B, 3, N)
    t = jnp.swapaxes(target.astype(jnp.float32), 1, 2)    # (B, 3, M)
    p_sq = jnp.sum(p * p, axis=1, keepdims=True)          # (B, 1, N)
    t_sq = jnp.sum(t * t, axis=1, keepdims=True)          # (B, 1, M)
    pred_aug = jnp.concatenate([p, jnp.ones_like(p_sq), p_sq], axis=1)         # (B,5,N)
    targ_aug = jnp.concatenate([-2.0 * t, t_sq, jnp.ones_like(t_sq)], axis=1)  # (B,5,M)

    if M_pad != M:
        # Sentinel "far" columns: [0,0,0, 1e30, 1] -> distance >= 1e30, never a
        # row-min; their column mins are masked out of the accumulation.
        pad = jnp.zeros((B, 5, M_pad - M), jnp.float32)
        pad = pad.at[:, 3, :].set(jnp.float32(1e30))
        pad = pad.at[:, 4, :].set(jnp.float32(1.0))
        targ_aug = jnp.concatenate([targ_aug, pad], axis=2)

    kernel = _make_chamfer_kernel(N, M, Mt, M_pad != M)

    partial = pl.pallas_call(
        kernel,
        out_shape=jax.ShapeDtypeStruct((B, 1, 1), jnp.float32),
        grid_spec=pltpu.PrefetchScalarGridSpec(
            num_scalar_prefetch=0,
            grid=(B // Bt, M_pad // Mt),
            in_specs=[
                pl.BlockSpec((Bt, 5, N), lambda bg, mg: (bg, 0, 0)),
                pl.BlockSpec((Bt, 5, Mt), lambda bg, mg: (bg, 0, mg)),
            ],
            out_specs=pl.BlockSpec((Bt, 1, 1), lambda bg, mg: (bg, 0, 0)),
            scratch_shapes=[
                pltpu.VMEM((Bt, N, 1), jnp.float32),   # running row-min
                pltpu.VMEM((Bt, 1, 1), jnp.float32),   # column-min sum
            ],
        ),
        compiler_params=pltpu.CompilerParams(
            dimension_semantics=("parallel", "arbitrary"),
            vmem_limit_bytes=48 * 1024 * 1024,
        ),
    )(pred_aug, targ_aug)

    # Batch mean + rate term in plain XLA (B scalars).
    return jnp.mean(partial) + lamda * bpp


def _reference_loss(pred, target, bpp, lamda):
    # Pure-JAX reference (pytorch3d chamfer_distance semantics, no normals).
    p = pred.astype(jnp.float32)
    t = target.astype(jnp.float32)
    d = jnp.sum((p[:, :, None, :] - t[:, None, :, :]) ** 2, axis=-1)
    cham_x = jnp.mean(jnp.min(d, axis=2), axis=1)   # (B,)
    cham_y = jnp.mean(jnp.min(d, axis=1), axis=1)   # (B,)
    return jnp.mean(cham_x) + jnp.mean(cham_y) + lamda * bpp


if __name__ == "__main__":
    key = jax.random.PRNGKey(0)
    k1, k2, k3, k4, k5, k6 = jax.random.split(key, 6)

    # --- Test 1: aligned shapes, f32 (target is (B, C*N, 3) with C=2) ---
    B, N, M = 2, 64, 128
    pred = jax.random.normal(k1, (B, N, 3), dtype=jnp.float32)
    target = jax.random.normal(k2, (B, M, 3), dtype=jnp.float32)
    bpp, lamda = 0.75, 0.01
    loss = jax.block_until_ready(get_loss(pred, target, bpp, lamda))
    ref = _reference_loss(pred, target, bpp, lamda)
    assert jnp.allclose(loss, ref, rtol=2e-4, atol=2e-4), (loss, ref)

    # --- Test 2: non-(8,128)-aligned point counts, odd batch, f32 ---
    B2, N2, M2 = 3, 60, 96
    pred2 = jax.random.normal(k3, (B2, N2, 3), dtype=jnp.float32)
    target2 = jax.random.normal(k4, (B2, M2, 3), dtype=jnp.float32)
    loss2 = jax.block_until_ready(get_loss(pred2, target2, 0.5, 0.1))
    ref2 = _reference_loss(pred2, target2, 0.5, 0.1)
    assert jnp.allclose(loss2, ref2, rtol=2e-4, atol=2e-4), (loss2, ref2)

    # --- Test 3: bf16 inputs (augmented operands built in f32 for accuracy) ---
    pred3 = pred.astype(jnp.bfloat16)
    target3 = target.astype(jnp.bfloat16)
    loss3 = jax.block_until_ready(get_loss(pred3, target3, bpp, lamda))
    ref3 = _reference_loss(pred3, target3, bpp, lamda)
    assert jnp.allclose(loss3, ref3, rtol=1e-3, atol=1e-3), (loss3, ref3)

    # --- Test 4: force the streaming M path (multi-chunk + sentinel padding +
    #             in-kernel column mask) with a tiny dmat budget ---
    B4, N4, M4 = 2, 64, 200
    pred4 = jax.random.normal(k5, (B4, N4, 3), dtype=jnp.float32)
    target4 = jax.random.normal(k6, (B4, M4, 3), dtype=jnp.float32)
    loss4 = jax.block_until_ready(
        get_loss(pred4, target4, 0.3, 0.05, dmat_budget_bytes=32 * 1024))
    ref4 = _reference_loss(pred4, target4, 0.3, 0.05)
    assert jnp.allclose(loss4, ref4, rtol=2e-4, atol=2e-4), (loss4, ref4)

    print("KERNEL_OK")
</pallas_src>

<mosaic_0001>
module attributes {stable_mosaic.version = 11 : i64} {
  func.func @kernel(%arg0: i32, %arg1: i32, %arg2: memref<1x5x64xf32, #tpu.memory_space<vmem>>, %arg3: memref<1x5x128xf32, #tpu.memory_space<vmem>>, %arg4: memref<1x1x1xf32, #tpu.memory_space<vmem>>, %arg5: memref<1x64x1xf32, #tpu.memory_space<vmem>>, %arg6: memref<1x1x1xf32, #tpu.memory_space<vmem>>) attributes {dimension_semantics = [#tpu.dimension_semantics<parallel>, #tpu.dimension_semantics<arbitrary>], iteration_bounds = array<i64: 2, 1>, scalar_prefetch = 0 : i64, scratch_operands = 2 : i64, tpu.core_type = #tpu.core_type<tc>, window_params = [{transform_indices = @transform_0, window_bounds = array<i64: 1, 5, 64>}, {transform_indices = @transform_1, window_bounds = array<i64: 1, 5, 128>}, {transform_indices = @transform_2, window_bounds = array<i64: 1, 1, 1>}]} {
    %c0_i32 = arith.constant 0 : i32
    %0 = arith.cmpi eq, %arg1, %c0_i32 : i32
    %1 = arith.extui %0 : i1 to i32
    %c0_i32_0 = arith.constant 0 : i32
    %2 = arith.cmpi ne, %1, %c0_i32_0 : i32
    scf.if %2 {
      %cst_24 = arith.constant 0x7F800000 : f32
      %23 = vector.broadcast %cst_24 : f32 to vector<1x64x1xf32>
      %c0_25 = arith.constant 0 : index
      %c0_26 = arith.constant 0 : index
      %c0_27 = arith.constant 0 : index
      %24 = vector.load %arg5[%c0_25, %c0_26, %c0_27] : memref<1x64x1xf32, #tpu.memory_space<vmem>>, vector<1x64x1xf32>
      tpu.vector_store %arg5[%c0_25, %c0_26, %c0_27], %23 {strides = array<i32>} : memref<1x64x1xf32, #tpu.memory_space<vmem>>, vector<1x64x1xf32>,
      %cst_28 = arith.constant 0.000000e+00 : f32
      %25 = vector.broadcast %cst_28 : f32 to vector<1x1x1xf32>
      %c0_29 = arith.constant 0 : index
      %c0_30 = arith.constant 0 : index
      %c0_31 = arith.constant 0 : index
      %26 = vector.load %arg6[%c0_29, %c0_30, %c0_31] : memref<1x1x1xf32, #tpu.memory_space<vmem>>, vector<1x1x1xf32>
      tpu.vector_store %arg6[%c0_29, %c0_30, %c0_31], %25 {strides = array<i32>} : memref<1x1x1xf32, #tpu.memory_space<vmem>>, vector<1x1x1xf32>,
    } else {
    }
    %c0 = arith.constant 0 : index
    %c0_1 = arith.constant 0 : index
    %c0_2 = arith.constant 0 : index
    %3 = vector.load %arg2[%c0, %c0_1, %c0_2] : memref<1x5x64xf32, #tpu.memory_space<vmem>>, vector<1x5x64xf32>
    %c0_3 = arith.constant 0 : index
    %c0_4 = arith.constant 0 : index
    %c0_5 = arith.constant 0 : index
    %4 = vector.load %arg3[%c0_3, %c0_4, %c0_5] : memref<1x5x128xf32, #tpu.memory_space<vmem>>, vector<1x5x128xf32>
    "tpu.trace_start"() <{level = 10 : i32, message = "bkn,bkm->bnm"}> : () -> ()
    %cst = arith.constant dense<0.000000e+00> : vector<1x64x128xf32>
    %5 = tpu.matmul %3, %4, %cst {dimension_numbers = #tpu.dot_dimension_numbers<[1], [1], [2], [2], [0, 0, 0, 2, 1, 2], [0], [0]>} : vector<1x5x64xf32>, vector<1x5x128xf32>, vector<1x64x128xf32> -> vector<1x64x128xf32>
    "tpu.trace_stop"() : () -> ()
    %c0_6 = arith.constant 0 : index
    %c0_7 = arith.constant 0 : index
    %c0_8 = arith.constant 0 : index
    %6 = vector.load %arg5[%c0_6, %c0_7, %c0_8] : memref<1x64x1xf32, #tpu.memory_space<vmem>>, vector<1x64x1xf32>
    %cst_9 = arith.constant dense<0x7F800000> : vector<1x64xf32>
    %7 = vector.multi_reduction <minimumf>, %5, %cst_9 [2] : vector<1x64x128xf32> to vector<1x64xf32>
    %8 = vector.shape_cast %7 : vector<1x64xf32> to vector<1x64x1xf32>
    %9 = arith.minimumf %6, %8 : vector<1x64x1xf32>
    %c0_10 = arith.constant 0 : index
    %c0_11 = arith.constant 0 : index
    %c0_12 = arith.constant 0 : index
    %10 = vector.load %arg5[%c0_10, %c0_11, %c0_12] : memref<1x64x1xf32, #tpu.memory_space<vmem>>, vector<1x64x1xf32>
    tpu.vector_store %arg5[%c0_10, %c0_11, %c0_12], %9 {strides = array<i32>} : memref<1x64x1xf32, #tpu.memory_space<vmem>>, vector<1x64x1xf32>,
    %cst_13 = arith.constant dense<0x7F800000> : vector<1x128xf32>
    %11 = vector.multi_reduction <minimumf>, %5, %cst_13 [1] : vector<1x64x128xf32> to vector<1x128xf32>
    %12 = vector.shape_cast %11 : vector<1x128xf32> to vector<1x1x128xf32>
    %cst_14 = arith.constant 0.000000e+00 : f32
    %13 = vector.broadcast %cst_14 : f32 to vector<1x1x128xf32>
    %14 = arith.maximumf %12, %13 : vector<1x1x128xf32>
    %c0_15 = arith.constant 0 : index
    %c0_16 = arith.constant 0 : index
    %c0_17 = arith.constant 0 : index
    %15 = vector.load %arg6[%c0_15, %c0_16, %c0_17] : memref<1x1x1xf32, #tpu.memory_space<vmem>>, vector<1x1x1xf32>
    %cst_18 = arith.constant dense<0.000000e+00> : vector<1x1xf32>
    %16 = vector.multi_reduction <add>, %14, %cst_18 [2] : vector<1x1x128xf32> to vector<1x1xf32>
    %17 = vector.shape_cast %16 : vector<1x1xf32> to vector<1x1x1xf32>
    %18 = arith.addf %15, %17 : vector<1x1x1xf32>
    %c0_19 = arith.constant 0 : index
    %c0_20 = arith.constant 0 : index
    %c0_21 = arith.constant 0 : index
    %19 = vector.load %arg6[%c0_19, %c0_20, %c0_21] : memref<1x1x1xf32, #tpu.memory_space<vmem>>, vector<1x1x1xf32>
    tpu.vector_store %arg6[%c0_19, %c0_20, %c0_21], %18 {strides = array<i32>} : memref<1x1x1xf32, #tpu.memory_space<vmem>>, vector<1x1x1xf32>,
    %c0_i32_22 = arith.constant 0 : i32
    %20 = arith.cmpi eq, %arg1, %c0_i32_22 : i32
    %21 = arith.extui %20 : i1 to i32
    %c0_i32_23 = arith.constant 0 : i32
    %22 = arith.cmpi ne, %21, %c0_i32_23 : i32
    scf.if %22 {
      %c0_24 = arith.constant 0 : index
      %c0_25 = arith.constant 0 : index
      %c0_26 = arith.constant 0 : index
      %23 = vector.load %arg5[%c0_24, %c0_25, %c0_26] : memref<1x64x1xf32, #tpu.memory_space<vmem>>, vector<1x64x1xf32>
      %cst_27 = arith.constant 0.000000e+00 : f32
      %24 = vector.broadcast %cst_27 : f32 to vector<1x64x1xf32>
      %25 = arith.maximumf %23, %24 : vector<1x64x1xf32>
      %cst_28 = arith.constant dense<0.000000e+00> : vector<1x1xf32>
      %26 = vector.multi_reduction <add>, %25, %cst_28 [1] : vector<1x64x1xf32> to vector<1x1xf32>
      %27 = vector.shape_cast %26 : vector<1x1xf32> to vector<1x1x1xf32>
      %cst_29 = arith.constant 1.562500e-02 : f32
      %28 = vector.broadcast %cst_29 : f32 to vector<1x1x1xf32>
      %29 = arith.mulf %27, %28 : vector<1x1x1xf32>
      %c0_30 = arith.constant 0 : index
      %c0_31 = arith.constant 0 : index
      %c0_32 = arith.constant 0 : index
      %30 = vector.load %arg6[%c0_30, %c0_31, %c0_32] : memref<1x1x1xf32, #tpu.memory_space<vmem>>, vector<1x1x1xf32>
      %cst_33 = arith.constant 7.812500e-03 : f32
      %31 = vector.broadcast %cst_33 : f32 to vector<1x1x1xf32>
      %32 = arith.mulf %30, %31 : vector<1x1x1xf32>
      %33 = arith.addf %29, %32 : vector<1x1x1xf32>
      %c0_34 = arith.constant 0 : index
      %c0_35 = arith.constant 0 : index
      %c0_36 = arith.constant 0 : index
      %34 = vector.load %arg4[%c0_34, %c0_35, %c0_36] : memref<1x1x1xf32, #tpu.memory_space<vmem>>, vector<1x1x1xf32>
      tpu.vector_store %arg4[%c0_34, %c0_35, %c0_36], %33 {strides = array<i32>} : memref<1x1x1xf32, #tpu.memory_space<vmem>>, vector<1x1x1xf32>,
    } else {
    }
    return
  }
  func.func @transform_0(%arg0: i32, %arg1: i32) -> (i32, i32, i32) {
    %c0_i32 = arith.constant 0 : i32
    %c0_i32_0 = arith.constant 0 : i32
    %c0_i32_1 = arith.constant 0 : i32
    return %arg0, %c0_i32, %c0_i32_0 : i32, i32, i32
  }
  func.func @transform_1(%arg0: i32, %arg1: i32) -> (i32, i32, i32) {
    %c0_i32 = arith.constant 0 : i32
    %c0_i32_0 = arith.constant 0 : i32
    return %arg0, %c0_i32, %arg1 : i32, i32, i32
  }
  func.func @transform_2(%arg0: i32, %arg1: i32) -> (i32, i32, i32) {
    %c0_i32 = arith.constant 0 : i32
    %c0_i32_0 = arith.constant 0 : i32
    %c0_i32_1 = arith.constant 0 : i32
    return %arg0, %c0_i32, %c0_i32_0 : i32, i32, i32
  }
}

</mosaic_0001>

<bundles_post_ra>
// kernel: tpu_custom_call.1
= control target key start
LH: loop header
LB: loop body
LE: loop exit
PB: predicated region body
PF: predicated region fallthrough
CT: control target
= control target key end

     0   :  { %s560_s9 = smov 0   ;;  %s562_s10 = smov 0   ;;  %s635_s0 = inlined_call_operand.vmem [shape: f32[2,5,64], index: 0, kind: input, shape index: {}]   ;;  %s636_s1 = inlined_call_operand.vmem [shape: f32[2,5,128], index: 1, kind: input, shape index: {}]   ;;  %s637_s2 = inlined_call_operand.vmem [shape: f32[2,1,1], index: 2, kind: output, shape index: {}]  }
   0x1   :  { %s564_s11 = smov 0  }
   0x2 LB: > { %s24_s12 = sadd.s32 1, %s537_s10  ;;  %p476_p0 = scmp.ge.s32.totalorder %s541_s11, 1  ;;  %s541_s11 = sphi %s564_s11, %s12_s11   ;;  %s537_s10 = sphi %s562_s10, %s639_s10   ;;  %s533_s9 = sphi %s560_s9, %s638_s9  }
   0x3   : > { %p26_p1 = scmp.ge.s32.totalorder %s24_s12, 2  ;;  %p137_p2 = scmp.lt.s32.totalorder %s541_s11, 3 }
   0x5   : > { %s641_s12 = smov (%p26_p1, %s24_s12), 0  ;;  %p138_p3 = pnand %p476_p0, %p137_p2 }
   0x6   : > { %p163_p4 = scmp.lt.s32.totalorder (!%p138_p3), %s533_s9, 1 }
   0x7   : > { %141 = sbr.rel (%p138_p3) target bundleno = 520 (0x208), region = 28 }
   0xc   : > { %s643_s9 = smov (!%p163_p4, %s533_s9), 1  ;;  %vm251_vm0 = vcmask 1044480   ;;  %vm226_vm1 = vcmask 39936   ;;  %vm181_vm2 = vcmask 7168   ;;  %v543_v16 = vmov inf  }
   0xd   : > { %s477_s13 = sshll.u32 %s643_s9, 3  ;;  %182 = vst.msk [vmem:[#allocation2] sm:$0xff] %vm181_vm2, %v543_v16  ;;  %vm190_vm3 = vcmask 0   ;;  %v544_v45 = vmov 0.0   ;;  %s176_s22 = scalar_lea.vmem %s637_s2, %s643_s9 }
   0xe   : > { %s166_s16 = scalar_lea.vmem %s635_s0, %s477_s13  ;;  %s173_s19 = scalar_lea.vmem %s636_s1, %s477_s13  ;;  %183 = vst.msk [vmem:[#allocation2 + $0x8] sm:$0xff] %vm181_vm2, %v543_v16 }
   0xf   : > { %v192_v0 = vld [vmem:[%s166_s16] sm:$0x1f]  ;;  %184 = vst.msk [vmem:[#allocation2 + $0x10] sm:$0xff] %vm181_vm2, %v543_v16 }
  0x10   : > { %v193_v1 = vld [vmem:[%s173_s19] sm:$0x1f]  ;;  %194 = vxpose.xlu0.b32.start.end [1/1] (short) (narrow) %v192_v0, 64  ;;  %185 = vst.msk [vmem:[#allocation2 + $0x18] sm:$0xff] %vm181_vm2, %v543_v16 }
  0x11   : > { %479 = vmatpush.msk.msra.mxu0 %vm251_vm0, %v193_v1  ;;  %490 = vmatpush.msk.msra.mxu1 %vm251_vm0, %v193_v1  ;;  %186 = vst.msk [vmem:[#allocation2 + $0x20] sm:$0xff] %vm181_vm2, %v543_v16 }
  0x12   : > { %491 = vmatpush.msk.msra.mxu2 %vm251_vm0, %v193_v1  ;;  %492 = vmatpush.msk.msra.mxu3 %vm251_vm0, %v193_v1  ;;  %187 = vst.msk [vmem:[#allocation2 + $0x28] sm:$0xff] %vm181_vm2, %v543_v16 }
  0x13   : > { %188 = vst.msk [vmem:[#allocation2 + $0x30] sm:$0xff] %vm181_vm2, %v543_v16 }
  0x14   : > { %189 = vst.msk [vmem:[#allocation2 + $0x38] sm:$0xff] %vm181_vm2, %v543_v16  ;;  %v296_v33 = vld [vmem:[#allocation2] sm:$0xff] }
  0x15   : > { %v297_v36 = vld [vmem:[#allocation2 + $0x8] sm:$0xff]  ;;  %191 = vst.msk [vmem:[#allocation3] sm:$0x1] %vm190_vm3, %v544_v45 }
  0x16   : > { %v298_v39 = vld [vmem:[#allocation2 + $0x10] sm:$0xff] }
  0x17   : > { %v299_v42 = vld [vmem:[#allocation2 + $0x18] sm:$0xff] }
  0x18   : > { %v300_v46 = vld [vmem:[#allocation2 + $0x20] sm:$0xff] }
  0x19   : > { %v301_v49 = vld [vmem:[#allocation2 + $0x28] sm:$0xff] }
  0x1a   : > { %v302_v52 = vld [vmem:[#allocation2 + $0x30] sm:$0xff] }
  0x1b   : > { %v303_v62 = vld [vmem:[#allocation2 + $0x38] sm:$0xff] }
  0xb4   : > { %v210_v2 = vpop.trf.xlu0 }
  0xb5   : > { %480 = vmatmul.msk.f32.vlgmr.msra.gmra.mxu0 %vm226_vm1, %v210_v2 }
  0xbc   : > { %v211_v3 = vpop.trf.xlu0 }
  0xbd   : > { %481 = vmatmul.msk.f32.gmra.mxu0 %vm226_vm1, %v211_v3 }
  0xc4   : > { %v212_v4 = vpop.trf.xlu0 }
  0xc5   : > { %482 = vmatmul.msk.f32.vlgmr.msra.gmra.mxu1 %vm226_vm1, %v212_v4 }
  0xcc   : > { %v213_v5 = vpop.trf.xlu0 }
  0xcd   : > { %483 = vmatmul.msk.f32.gmra.mxu1 %vm226_vm1, %v213_v5 }
  0xd4   : > { %v214_v6 = vpop.trf.xlu0 }
  0xd5   : > { %484 = vmatmul.msk.f32.vlgmr.msra.gmra.mxu2 %vm226_vm1, %v214_v6 }
  0xdc   : > { %v215_v7 = vpop.trf.xlu0 }
  0xdd   : > { %485 = vmatmul.msk.f32.gmra.mxu2 %vm226_vm1, %v215_v7 }
  0xe4   : > { %v216_v8 = vpop.trf.xlu0 }
  0xe5   : > { %486 = vmatmul.msk.f32.vlgmr.msra.gmra.mxu3 %vm226_vm1, %v216_v8 }
  0xec   : > { %v217_v9 = vpop.trf.xlu0 }
  0xed   : > { %487 = vmatmul.msk.f32.gmra.mxu3 %vm226_vm1, %v217_v9 }
 0x132   : > { %v272_v10 = vpop.f32.mrf.mxu0 }
 0x133   : > { %304 = vmin.xlane.f32.xlu0 %v272_v10 }
 0x13a   : > { %v275_v11 = vpop.f32.mrf.mxu0 }
 0x13b   : > { %306 = vmin.xlane.f32.xlu1 %v275_v11 }
 0x142   : > { %v278_v12 = vpop.f32.mrf.mxu1 }
 0x143   : > { %308 = vmin.xlane.f32.xlu1 %v278_v12 }
 0x14a   : > { %v281_v13 = vpop.f32.mrf.mxu1 }
 0x14b   : > { %310 = vmin.xlane.f32.xlu2 %v281_v13 }
 0x158   : > { %v284_v14 = vpop.f32.mrf.mxu2 }
 0x159   : > { %312 = vmin.xlane.f32.xlu2 %v284_v14  ;;  %v337_v20 = vmin.f32 %v272_v10, %v284_v14 }
 0x160   : > { %v287_v15 = vpop.f32.mrf.mxu2 }
 0x161   : > { %314 = vmin.xlane.f32.xlu1 %v287_v15  ;;  %v338_v18 = vmin.f32 %v275_v11, %v287_v15 }
 0x163   : > { %v341_v23 = vmin.f32 %v337_v20, %v338_v18 }
 0x168   : > { %v290_v17 = vpop.f32.mrf.mxu3 }
 0x169   : > { %316 = vmin.xlane.f32.xlu2 %v290_v17  ;;  %v339_v21 = vmin.f32 %v278_v12, %v290_v17 }
 0x170   : > { %v293_v19 = vpop.f32.mrf.mxu3 }
 0x171   : > { %v340_v22 = vmin.f32 %v281_v13, %v293_v19  ;;  %318 = vmin.xlane.f32.xlu1 %v293_v19 }
 0x173   : > { %v342_v24 = vmin.f32 %v339_v21, %v340_v22 }
 0x175   : > { %v343_v25 = vmin.f32 %v341_v23, %v342_v24 }
 0x177   : > { %v344_v26 = vrot.slane %v343_v25, 4 }
 0x179   : > { %v345_v27 = vmin.f32 %v343_v25, %v344_v26  ;;  %v351_v26 = vld [vmem:[#allocation3] sm:$0x1] }
 0x17b   : > { %v346_v28 = vrot.slane %v345_v27, 2 }
 0x17d   : > { %v347_v29 = vmin.f32 %v345_v27, %v346_v28 }
 0x17f   : > { %v348_v30 = vrot.slane %v347_v29, 1 }
 0x181   : > { %v349_v31 = vmin.f32 %v347_v29, %v348_v30 }
 0x183   : > { %v350_v32 = vmax.f32 %v349_v31, 0.0 }
 0x185   : > { %352 = vadd.xlane.f32.xlu2 %v350_v32 }
 0x1a6   : > { %v305_v34 = vpop.xlane.xlu0 %304 }
 0x1a7   : > { %v320_v35 = vmin.f32 %v296_v33, %v305_v34 }
 0x1a9   : > { %329 = vst.msk [vmem:[#allocation2] sm:$0xff] %vm181_vm2, %v320_v35 }
 0x1ae   : > { %v307_v37 = vpop.xlane.xlu1 %306 }
 0x1af   : > { %v321_v38 = vmin.f32 %v297_v36, %v307_v37 }
 0x1b0   : > { %v360_v56 = vld [vmem:[#allocation2] sm:$0xff] }
 0x1b1   : > { %330 = vst.msk [vmem:[#allocation2 + $0x8] sm:$0xff] %vm181_vm2, %v321_v38  ;;  %v368_v60 = vmax.f32 %v360_v56, 0.0 }
 0x1b3   : > { %v376_v7 = vsel %vm181_vm2, %v368_v60, 0.0 }
 0x1b6   : > { %v309_v40 = vpop.xlane.xlu1 %308 }
 0x1b7   : > { %v322_v41 = vmin.f32 %v298_v39, %v309_v40 }
 0x1b8   : > { %v361_v53 = vld [vmem:[#allocation2 + $0x8] sm:$0xff] }
 0x1b9   : > { %331 = vst.msk [vmem:[#allocation2 + $0x10] sm:$0xff] %vm181_vm2, %v322_v41  ;;  %v369_v58 = vmax.f32 %v361_v53, 0.0 }
 0x1bb   : > { %v377_v1 = vsel %vm181_vm2, %v369_v58, 0.0 }
 0x1bc   : > { %v378_v9 = vadd.f32 %v377_v1, %v376_v7 }
 0x1be   : > { %v311_v43 = vpop.xlane.xlu2 %310 }
 0x1bf   : > { %v323_v44 = vmin.f32 %v299_v42, %v311_v43 }
 0x1c0   : > { %v362_v57 = vld [vmem:[#allocation2 + $0x10] sm:$0xff] }
 0x1c1   : > { %332 = vst.msk [vmem:[#allocation2 + $0x18] sm:$0xff] %vm181_vm2, %v323_v44  ;;  %v370_v61 = vmax.f32 %v362_v57, 0.0 }
 0x1c3   : > { %v379_v6 = vsel %vm181_vm2, %v370_v61, 0.0 }
 0x1c4   : > { %v380_v12 = vadd.f32 %v379_v6, %v378_v9 }
 0x1c8   : > { %v363_v59 = vld [vmem:[#allocation2 + $0x18] sm:$0xff] }
 0x1c9   : > { %v371_v0 = vmax.f32 %v363_v59, 0.0 }
 0x1cb   : > { %v381_v11 = vsel %vm181_vm2, %v371_v0, 0.0 }
 0x1cc   : > { %v313_v47 = vpop.xlane.xlu2 %312  ;;  %v382_v15 = vadd.f32 %v381_v11, %v380_v12 }
 0x1cd   : > { %v324_v48 = vmin.f32 %v300_v46, %v313_v47 }
 0x1cf   : > { %333 = vst.msk [vmem:[#allocation2 + $0x20] sm:$0xff] %vm181_vm2, %v324_v48 }
 0x1d4   : > { %v315_v50 = vpop.xlane.xlu1 %314 }
 0x1d5   : > { %v325_v51 = vmin.f32 %v301_v49, %v315_v50 }
 0x1d6   : > { %v364_v63 = vld [vmem:[#allocation2 + $0x20] sm:$0xff] }
 0x1d7   : > { %334 = vst.msk [vmem:[#allocation2 + $0x28] sm:$0xff] %vm181_vm2, %v325_v51  ;;  %v372_v5 = vmax.f32 %v364_v63, 0.0 }
 0x1d9   : > { %v383_v14 = vsel %vm181_vm2, %v372_v5, 0.0 }
 0x1da   : > { %v384_v17 = vadd.f32 %v383_v14, %v382_v15 }
 0x1dc   : > { %v317_v54 = vpop.xlane.xlu2 %316 }
 0x1dd   : > { %v326_v55 = vmin.f32 %v302_v52, %v317_v54 }
 0x1de   : > { %v365_v3 = vld [vmem:[#allocation2 + $0x28] sm:$0xff] }
 0x1df   : > { %335 = vst.msk [vmem:[#allocation2 + $0x30] sm:$0xff] %vm181_vm2, %v326_v55  ;;  %v373_v10 = vmax.f32 %v365_v3, 0.0 }
 0x1e1   : > { %v385_v16 = vsel %vm181_vm2, %v373_v10, 0.0 }
 0x1e2   : > { %v386_v20 = vadd.f32 %v385_v16, %v384_v17 }
 0x1e4   : > { %v319_v2 = vpop.xlane.xlu1 %318 }
 0x1e5   : > { %v327_v4 = vmin.f32 %v303_v62, %v319_v2 }
 0x1e6   : > { %v366_v8 = vld [vmem:[#allocation2 + $0x30] sm:$0xff] }
 0x1e7   : > { %336 = vst.msk [vmem:[#allocation2 + $0x38] sm:$0xff] %vm181_vm2, %v327_v4  ;;  %v374_v13 = vmax.f32 %v366_v8, 0.0 }
 0x1e9   : > { %v387_v18 = vsel %vm181_vm2, %v374_v13, 0.0 }
 0x1ea   : > { %v388_v22 = vadd.f32 %v387_v18, %v386_v20 }
 0x1ee   : > { %v367_v19 = vld [vmem:[#allocation2 + $0x38] sm:$0xff] }
 0x1ef   : > { %v375_v21 = vmax.f32 %v367_v19, 0.0 }
 0x1f1   : > { %v389_v23 = vsel %vm181_vm2, %v375_v21, 0.0 }
 0x1f2   : > { %v390_v24 = vadd.f32 %v389_v23, %v388_v22 }
 0x1f4   : > { %v391_v25 = vrot.slane %v390_v24, 4 }
 0x1f6   : > { %v392_v27 = vadd.f32 %v391_v25, %v390_v24 }
 0x1f8   : > { %v353_v28 = vpop.xlane.xlu2 %352  ;;  %v393_v29 = vrot.slane %v392_v27, 2 }
 0x1f9   : > { %v354_v30 = vadd.f32 %v353_v28, %v351_v26 }
 0x1fa   : > { %v394_v31 = vadd.f32 %v393_v29, %v392_v27 }
 0x1fb   : > { %356 = vst.msk [vmem:[#allocation3] sm:$0x1] %vm190_vm3, %v354_v30 }
 0x1fc   : > { %v395_v32 = vrot.slane %v394_v31, 1 }
 0x1fe   : > { %v396_v33 = vadd.f32 %v395_v32, %v394_v31 }
 0x200   : > { %v397_v35 = vmul.f32 0.015625, %v396_v33 }
 0x202   : > { %v398_v34 = vld [vmem:[#allocation3] sm:$0x1] }
 0x203   : > { %v399_v36 = vmul.f32 0.0078125, %v398_v34 }
 0x205   : > { %v400_v37 = vadd.f32 %v399_v36, %v397_v35 }
 0x207   : > { %401 = vst.msk [vmem:[%s176_s22] sm:$0x1] %vm190_vm3, %v400_v37 }
 0x208 PF: > { %s12_s11 = sadd.s32 1, %s541_s11   ;;  %s638_s9 = smov %s537_s10 }
 0x209   : > { %p9_p5 = scmp.ge.s32.totalorder %s12_s11, 4   ;;  %s639_s10 = smov %s641_s12 }
 0x20b   :  { %11 = sbr.rel (!%p9_p5) target bundleno = 2 (0x2), region = 69 }

</bundles_post_ra>
